<compile_context>
chip_gen: v7x
topology: tpu7x:2x2x1
jax: 0.10.0
libtpu: 0.0.40
codegen_flags: <defaults>
</compile_context>

<pallas_src>
import math

import jax
import jax.numpy as jnp
from jax.experimental import pallas as pl
from jax.experimental.pallas import tpu as pltpu


def _round_up(x, m):
    return (x + m - 1) // m * m


def _round_down(x, m):
    return (x // m) * m


def _dyad_kernel(w_ref, bias_ref, x_ref, o_ref):
    """One column tile of the folded Dyad forward.

    w_ref    : (DOp, DIp) fused dense weight (bf16), resident across the grid
    bias_ref : (DOp, 1)   f32 bias column, resident
    x_ref    : (DIp, bn)  column tile of x (native dtype; cast in-kernel)
    o_ref    : (DOp, bn)  column tile of the output (f32)
    """
    x_tile = x_ref[...].astype(w_ref.dtype)
    acc = jnp.dot(w_ref[...], x_tile, preferred_element_type=jnp.float32)
    o_ref[...] = (acc + bias_ref[...]).astype(o_ref.dtype)


def _fold_weights(w_lower, w_upper):
    """Dense (D*O, D*I) f32 matrix equivalent to both Dyad paths."""
    D, O, I = w_lower.shape
    eye = jnp.eye(D, dtype=jnp.float32)
    # x1 path: out row d*O+o reads x row d*I+i  ->  block-diagonal in d.
    w_l_full = jnp.einsum(
        "doi,de->doei", w_lower.astype(jnp.float32), eye
    ).reshape(D * O, D * I)
    # x2 path: out row o*D+d reads x row i*D+d  ->  diagonal-in-d at stride D.
    w_u_full = jnp.einsum(
        "doi,de->odie", w_upper.astype(jnp.float32), eye
    ).reshape(D * O, D * I)
    return w_l_full + w_u_full


def prepare_dyad_weights(w_lower, w_upper, bias=None, *,
                         compute_dtype=jnp.bfloat16):
    """Fold + pad the Dyad weights.  Call once per weight update."""
    D, O, I = w_lower.shape
    DO, DI = D * O, D * I
    DOp, DIp = _round_up(DO, 8), _round_up(DI, 8)

    w_total = _fold_weights(w_lower, w_upper)
    if (DOp, DIp) != (DO, DI):
        w_total = jnp.pad(w_total, ((0, DOp - DO), (0, DIp - DI)))
    w_total = w_total.astype(compute_dtype)

    if bias is None:
        bias_col = jnp.zeros((DOp, 1), jnp.float32)
    else:
        b = bias.reshape(DO).astype(jnp.float32)
        if DOp != DO:
            b = jnp.pad(b, (0, DOp - DO))
        bias_col = b.reshape(DOp, 1)
    return w_total, bias_col


def dyad_forward_prepared(x, w_total, bias_col, dyad_shape, *,
                          block_n=16384, out_dtype=jnp.float32):
    """Pallas Dyad forward using pre-folded weights.

    x        : array whose flattened order matches the PyTorch input view
               (only x.size matters, like the "-1" reshape); any float dtype.
    w_total  : (DOp, DIp) folded/padded weight from prepare_dyad_weights.
    bias_col : (DOp, 1)   f32 bias column (zeros when the module has no bias).
    returns  : (D*dim_out, N) out_dtype.
    """
    D, O, I = dyad_shape
    DO, DI = D * O, D * I
    DOp, DIp = w_total.shape
    N = x.size // DI

    x2d = x.reshape(DI, N)                      # free metadata reshape
    if DIp != DI:
        x2d = jnp.pad(x2d, ((0, DIp - DI), (0, 0)))

    x_item = x2d.dtype.itemsize
    o_item = jnp.dtype(out_dtype).itemsize
    w_bytes = w_total.size * w_total.dtype.itemsize + bias_col.size * 4

    # VMEM budget for the double-buffered (x-in, out) column tiles; kept well
    # under v7x's 64 MiB physical VMEM so W_total stays resident everywhere.
    per_col = 2 * (DIp * x_item + DOp * o_item)          # double-buffered
    tile_budget = 48 * 1024 * 1024 - w_bytes
    bn_vmem = max(128, _round_down(max(tile_budget, per_col) // per_col, 128))

    if N >= 128:
        # Guarantee >= 2 grid steps so the "parallel" axis can shard across
        # the two TensorCores on v7x (and amortize per-step overhead).
        two_step_cap = max(128, _round_down(N // 2, 128))
        bn = max(128, min(_round_up(block_n, 128), two_step_cap, bn_vmem))
    else:
        bn = N                                   # full-dim block (legal)

    Np = _round_up(N, bn)
    if Np != N:
        # Pad N so every output tile is a full, unmasked lane-dense store.
        x2d = jnp.pad(x2d, ((0, 0), (0, Np - N)))
    grid = (Np // bn,)

    vmem_limit = int(min(w_bytes + bn * per_col + (4 << 20),
                         60 * 1024 * 1024))
    vmem_limit = max(vmem_limit, 16 * 1024 * 1024)

    out = pl.pallas_call(
        _dyad_kernel,
        out_shape=jax.ShapeDtypeStruct((DOp, Np), out_dtype),
        grid_spec=pltpu.PrefetchScalarGridSpec(
            num_scalar_prefetch=0,
            grid=grid,
            in_specs=[
                pl.BlockSpec((DOp, DIp), lambda j: (0, 0)),   # W_total (resident)
                pl.BlockSpec((DOp, 1), lambda j: (0, 0)),     # bias (resident)
                pl.BlockSpec((DIp, bn), lambda j: (0, j)),    # x column tile
            ],
            out_specs=pl.BlockSpec((DOp, bn), lambda j: (0, j)),
        ),
        compiler_params=pltpu.CompilerParams(
            dimension_semantics=("parallel",),
            vmem_limit_bytes=vmem_limit),
    )(w_total, bias_col, x2d)

    if DOp != DO or Np != N:
        out = out[:DO, :N]
    return out


def dyad_forward(x, w_lower, w_upper, bias=None, *, block_n=16384,
                 out_dtype=jnp.float32, compute_dtype=jnp.bfloat16):
    """Convenience wrapper: fold weights then run the kernel."""
    D, O, I = w_lower.shape
    w_total, bias_col = prepare_dyad_weights(
        w_lower, w_upper, bias, compute_dtype=compute_dtype)
    return dyad_forward_prepared(x, w_total, bias_col, (D, O, I),
                                 block_n=block_n, out_dtype=out_dtype)


def dyad_reference(x, w_lower, w_upper, bias=None):
    """Pure-JAX f32 reference mirroring the PyTorch forward exactly."""
    D, O, I = w_lower.shape
    N = x.size // (D * I)
    xf = x.reshape(-1)
    x1 = jnp.einsum('doi,din->don', w_lower,
                    xf.reshape(D, I, N)).reshape(D * O, N)
    x2 = jnp.einsum('doi,din->don', w_upper,
                    jnp.transpose(xf.reshape(I, D, N), (1, 0, 2)))
    x2 = jnp.transpose(x2, (1, 0, 2)).reshape(O * D, N)
    out = x1 + x2
    if bias is not None:
        out = out + bias.reshape(-1, 1)
    return out


if __name__ == "__main__":
    dyad_dim, dim_in, dim_out = 4, 8, 8
    N = 256
    has_bias = True

    k = 1.0 / math.sqrt(dyad_dim * dim_in)
    key = jax.random.PRNGKey(0)
    k_wl, k_wu, k_b, k_x = jax.random.split(key, 4)

    w_lower = jax.random.uniform(k_wl, (dyad_dim, dim_out, dim_in),
                                 jnp.float32, minval=-k, maxval=k)
    w_upper = jax.random.uniform(k_wu, (dyad_dim, dim_out, dim_in),
                                 jnp.float32, minval=-k, maxval=k)
    bias = (jax.random.uniform(k_b, (dyad_dim * dim_out,), jnp.float32,
                               minval=-k, maxval=k) if has_bias else None)
    x = jax.random.normal(k_x, (dyad_dim * dim_in, N), jnp.float32)

    # Fold/pad weights once (per weight update), then run the kernel.
    w_total, bias_col = prepare_dyad_weights(w_lower, w_upper, bias)
    out = dyad_forward_prepared(x, w_total, bias_col,
                                (dyad_dim, dim_out, dim_in))
    out = jax.block_until_ready(out)
    assert out.shape == (dyad_dim * dim_out, N)

    # Tight check against the exact bf16-quantized math the kernel performs.
    DIp = w_total.shape[1]
    xq = x.reshape(dyad_dim * dim_in, N).astype(jnp.bfloat16).astype(jnp.float32)
    if DIp != dyad_dim * dim_in:
        xq = jnp.pad(xq, ((0, DIp - dyad_dim * dim_in), (0, 0)))
    ref_q = (jnp.dot(w_total.astype(jnp.float32), xq)
             + bias_col)[: dyad_dim * dim_out, :N]
    assert jnp.allclose(out, ref_q, rtol=1e-4, atol=1e-4), \
        "mismatch vs bf16-quantized reference"

    # Loose check against the pure-f32 PyTorch-equivalent reference
    # (bf16 input rounding is the only deviation; accumulation stays f32).
    ref = dyad_reference(x, w_lower, w_upper, bias)
    assert jnp.allclose(out, ref, rtol=2e-2, atol=2e-2), \
        "mismatch vs f32 reference"

    print("KERNEL_OK")
</pallas_src>

<mosaic_0001>
module attributes {stable_mosaic.version = 11 : i64} {
  func.func @_dyad_kernel(%arg0: i32, %arg1: memref<32x32xbf16, #tpu.memory_space<vmem>>, %arg2: memref<32x1xf32, #tpu.memory_space<vmem>>, %arg3: memref<32x128xf32, #tpu.memory_space<vmem>>, %arg4: memref<32x128xf32, #tpu.memory_space<vmem>>) attributes {dimension_semantics = [#tpu.dimension_semantics<parallel>], iteration_bounds = array<i64: 2>, scalar_prefetch = 0 : i64, scratch_operands = 0 : i64, tpu.core_type = #tpu.core_type<tc>, window_params = [{pipeline_mode = #tpu.pipeline_mode<synchronous>, transform_indices = @transform_0, window_bounds = array<i64: 32, 32>}, {pipeline_mode = #tpu.pipeline_mode<synchronous>, transform_indices = @transform_1, window_bounds = array<i64: 32, 1>}, {transform_indices = @transform_2, window_bounds = array<i64: 32, 128>}, {transform_indices = @transform_3, window_bounds = array<i64: 32, 128>}]} {
    %c0 = arith.constant 0 : index
    %c0_0 = arith.constant 0 : index
    %0 = vector.load %arg3[%c0, %c0_0] : memref<32x128xf32, #tpu.memory_space<vmem>>, vector<32x128xf32>
    %1 = arith.truncf %0 : vector<32x128xf32> to vector<32x128xbf16>
    %c0_1 = arith.constant 0 : index
    %c0_2 = arith.constant 0 : index
    %2 = vector.load %arg1[%c0_1, %c0_2] : memref<32x32xbf16, #tpu.memory_space<vmem>>, vector<32x32xbf16>
    %cst = arith.constant dense<0.000000e+00> : vector<32x128xf32>
    %3 = tpu.matmul %2, %1, %cst {dimension_numbers = #tpu.dot_dimension_numbers<[1], [0], [0], [1], [0, 0, 1, 1], [], []>} : vector<32x32xbf16>, vector<32x128xbf16>, vector<32x128xf32> -> vector<32x128xf32>
    %c0_3 = arith.constant 0 : index
    %c0_4 = arith.constant 0 : index
    %4 = vector.load %arg2[%c0_3, %c0_4] : memref<32x1xf32, #tpu.memory_space<vmem>>, vector<32x1xf32>
    %5 = vector.broadcast %4 : vector<32x1xf32> to vector<32x128xf32>
    %6 = arith.addf %3, %5 : vector<32x128xf32>
    %c0_5 = arith.constant 0 : index
    %c0_6 = arith.constant 0 : index
    %7 = vector.load %arg4[%c0_5, %c0_6] : memref<32x128xf32, #tpu.memory_space<vmem>>, vector<32x128xf32>
    tpu.vector_store %arg4[%c0_5, %c0_6], %6 {strides = array<i32>} : memref<32x128xf32, #tpu.memory_space<vmem>>, vector<32x128xf32>,
    return
  }
  func.func @transform_0(%arg0: i32) -> (i32, i32) {
    %c0_i32 = arith.constant 0 : i32
    %c0_i32_0 = arith.constant 0 : i32
    %c0_i32_1 = arith.constant 0 : i32
    return %c0_i32, %c0_i32_0 : i32, i32
  }
  func.func @transform_1(%arg0: i32) -> (i32, i32) {
    %c0_i32 = arith.constant 0 : i32
    %c0_i32_0 = arith.constant 0 : i32
    %c0_i32_1 = arith.constant 0 : i32
    return %c0_i32, %c0_i32_0 : i32, i32
  }
  func.func @transform_2(%arg0: i32) -> (i32, i32) {
    %c0_i32 = arith.constant 0 : i32
    %c0_i32_0 = arith.constant 0 : i32
    return %c0_i32, %arg0 : i32, i32
  }
  func.func @transform_3(%arg0: i32) -> (i32, i32) {
    %c0_i32 = arith.constant 0 : i32
    %c0_i32_0 = arith.constant 0 : i32
    return %c0_i32, %arg0 : i32, i32
  }
}

</mosaic_0001>

<bundles_post_ra>
// kernel: tpu_custom_call.1
= control target key start
LH: loop header
LB: loop body
LE: loop exit
PB: predicated region body
PF: predicated region fallthrough
CT: control target
= control target key end

     0   :  { %8 = vsyncpa [#allocation3], 0  ;;  %s779_s0 = inlined_call_operand.vmem [shape: bf16[32,32], index: 0, kind: input, shape index: {}]   ;;  %s780_s1 = inlined_call_operand.vmem [shape: f32[32,1], index: 1, kind: input, shape index: {}]   ;;  %s781_s2 = inlined_call_operand.hbm [shape: f32[32,256], index: 2, kind: input, shape index: {}]   ;;  %s782_s3 = inlined_call_operand.hbm [shape: f32[32,256], index: 3, kind: output, shape index: {}]  }
   0x1   :  { %10 = vsyncpa [#allocation3 + $0x1], 0 }
   0x2   :  { %11 = vsyncpa [#allocation4], 0 }
   0x3   :  { %13 = vsyncpa [#allocation4 + $0x1], 0  ;;  %s591_s12 = smov 0   ;;  %s593_s13 = smov 0  }
   0x4   :  { %s595_s14 = smov 0   ;;  %s597_s15 = smov 0  }
   0x5 LB: > { %s612_s16 = sadd.s32 4294967295, %s560_s15   ;;  %s379_s17 = sadd.s32 4294967294, %s560_s15   ;;  %s560_s15 = sphi %s597_s15, %s796_s15   ;;  %s556_s14 = sphi %s595_s14, %s795_s14   ;;  %s552_s13 = sphi %s593_s13, %s794_s13   ;;  %s548_s12 = sphi %s591_s12, %s793_s12  }
   0x6   : > { %s616_s18 = sadd.s32 1, %s560_s15   ;;  %s68_s19 = sadd.s32 1, %s556_s14 }
   0x7   : > { %s65_s20 = ssub.s32 %s560_s15, %s616_s18  ;;  %p75_p0 = scmp.ne.s32.totalorder %s556_s14, %s552_s13 }
   0x8   : > { %p66_p1 = scmp.eq.s32.totalorder %s65_s20, 0  ;;  %p76_p2 = scmp.eq.s32.totalorder %s560_s15, 0 }
   0x9   : > { %p81_p3 = scmp.ne.s32.totalorder %s552_s13, %s548_s12  ;;  %p82_p4 = scmp.eq.s32.totalorder %s612_s16, 0 }
   0xa   : > { %s628_s21 = scalar_select %p66_p1, %s556_s14, %s68_s19  }
   0xb   : > { %p630_p5 = por %p76_p2, %p75_p0  ;;  %p634_p6 = por %p82_p4, %p81_p3 }
   0xc   : > { %p105_p7 = scmp.eq.s32.totalorder %s612_s16, 1  ;;  %p111_p8 = scmp.eq.s32.totalorder %s379_s17, 1 }
   0xd   : > { %p419_p10 = scmp.lt.s32.totalorder %s560_s15, 2  ;;  %s137_s26 = sand.u32 1, %s556_s14  }
   0xe   : > { %p641_p11 = por %p105_p7, %p75_p0  ;;  %p645_p12 = por %p111_p8, %p81_p3 }
   0xf   : > { %s383_s27 = sshll.u32 %s560_s15, 7  ;;  %s382_s28 = sshll.u32 %s137_s26, 5 }
  0x10   : > { %s786_s24 = scalar_select %p641_p11, 1, 0 }
  0x11   : > { %s787_s25 = scalar_select %p645_p12, 1, 0 }
  0x12   : > { %s654_s4 = scalar_lea.hbm %s781_s2, %s383_s27  ;;  %s141_s5 = scalar_lea.vmem [#allocation2], %s382_s28 }
  0x13   : > { %s147_s6 = sshll.u32 %s141_s5, 4  ;;  %p658_p13 = pnand %p419_p10, %p630_p5  ;;  %s662_s6 = int_to_ptr.vmem [resolvable:$true] %s147_s6 }
  0x14   : > { %s665_s8 = scalar_lea.sflag [#allocation3], %s137_s26  ;;  %s464_s9 = scalar_lea.hbm %s654_s4, 512 }
  0x15   : > { %p465_p1 = scmp.ne.s32.totalorder %s654_s4, %s464_s9  ;;  %p466_p2 = pneg %p658_p13 }
  0x16   : > { %s469_s17 = scalar_lea.hbm %s781_s2, 1024  ;;  %p470_p5 = scmp.lt.u32.totalorder %s654_s4, %s781_s2 }
  0x17   : > { %p467_p3 = pnand %p466_p2, %p465_p1  ;;  %p471_p7 = scmp.lt.u32.totalorder %s469_s17, %s464_s9 }
  0x18   : > { %p473_p10 = scmp.lt.u32.totalorder %s464_s9, %s654_s4 }
  0x19   : > { %p468_p4 = pneg %p467_p3  ;;  %p472_p8 = por %p471_p7, %p470_p5 }
  0x1b   : > { %p474_p9 = por %p473_p10, %p472_p8 }
  0x1d   : > { %p475_p0 = pnand %p474_p9, %p468_p4 }
  0x1f   : > { %478 = shalt.err (!%p475_p0)
}
  0x20   : > { %s479_s22 = scalar_lea.vmem %s662_s6, 512  ;;  %s562_s26 = smov [#allocation2]  }
  0x21   : > { %p480_p1 = scmp.ne.s32.totalorder %s662_s6, %s479_s22  ;;  %s484_s27 = sshll.u32 %s562_s26, 4  ;;  %s485_s27 = int_to_ptr.vmem [resolvable:$false] %s484_s27 }
  0x22   : > { %s486_s28 = scalar_lea.vmem %s485_s27, 1024  ;;  %p487_p11 = scmp.lt.s32.totalorder %s662_s6, %s485_s27 }
  0x23   : > { %p482_p3 = pnand %p480_p1, %p466_p2  ;;  %p488_p5 = scmp.lt.s32.totalorder %s486_s28, %s479_s22 }
  0x25   : > { %p483_p12 = pneg %p482_p3  ;;  %p489_p7 = por %p488_p5, %p487_p11 }
  0x27   : > { %p490_p8 = pnand %p489_p7, %p483_p12 }
  0x29   : > { %493 = shalt.err (!%p490_p8)
}
  0x2a   : > { %s563_s29 = smov 256   ;;  %s564_s30 = smov 128  }
  0x2b   : > { %s565_s5 = smov 8   ;;  %p155_p9 = scmp.lt.s32.totalorder %s560_s15, 3 }
  0x2c   : > { %414 = dma.hbm_to_vmem [thread:$0]  (!%p658_p13), %s654_s4, 512, %s662_s6, %s665_s8, %s563_s29, %s564_s30, %s565_s5  }
  0x2d   : > { %p789_p0 = scmp.ge.s32.totalorder %s560_s15, 1 }
  0x2f   : > { %p156_p2 = pnand %p789_p0, %p155_p9 }
  0x30   : > { %s697_s9 = sand.u32 (!%p156_p2), 1, %s552_s13  }
  0x31   : > { %159 = sbr.rel (%p156_p2) target bundleno = 301 (0x12d), region = 32  ;;  %s385_s10 = sshll.u32 (!%p156_p2), %s697_s9, 5 }
  0x32   : > { %s162_s11 = scalar_lea.sflag (!%p156_p2), [#allocation3], %s697_s9  ;;  %s165_s17 = scalar_lea.vmem (!%p156_p2), [#allocation2], %s385_s10 }
  0x38   : > { %539 = dma.done.wait (%p634_p6), %s162_s11, 512  }
  0x39   : > { %541 = vsyncadd (%p634_p6), %s162_s11, 4294966784  ;;  %v566_v0 = vmov 0   ;;  %v189_v1 = vld [vmem:[%s165_s17] sm:$0xff]  ;;  %v190_v2 = vld [vmem:[%s165_s17 + $0x8] sm:$0xff]  ;;  %vm233_vm0 = vcmask 261120   ;;  %s187_s30 = scalar_lea.vmem [#allocation5], %s385_s10 }
  0x3a   : > { %461 = vset.pattern.permute.xlu1 %v566_v0  ;;  %460 = vset.pattern.permute.xlu0 %v566_v0  ;;  %v191_v3 = vld [vmem:[%s165_s17 + $0x10] sm:$0xff]  ;;  %v193_v4 = vpack.c.bf16 %v190_v2, %v189_v1  ;;  %v192_v5 = vld [vmem:[%s165_s17 + $0x18] sm:$0xff]  ;;  %v462_v7 = vld [vmem:[%s779_s0] sm:$0xff]   ;;  %s306_s5 = sshll.u32 %s187_s30, 4  ;;  %s392_s11 = sshll.u32 %s612_s16, 7  ;;  %s730_s5 = int_to_ptr.vmem [resolvable:$true] %s306_s5 }
  0x3b   : > { %v194_v6 = vpack.c.bf16 %v192_v5, %v191_v3  ;;  %v201_v8 = vld [vmem:[%s780_s1 + $0x10] sm:$0xff]  ;;  %v199_v9 = vld [vmem:[%s780_s1] sm:$0xff]  ;;  %403 = vmatprep.mubr.msk.bf16.mxu0 %vm233_vm0, %v462_v7  ;;  %v202_v10 = vld [vmem:[%s780_s1 + $0x18] sm:$0xff]  ;;  %s735_s16 = scalar_lea.hbm %s782_s3, %s392_s11  ;;  %s294_s4 = scalar_lea.sflag [#allocation4], %s697_s9 }
  0x3c   : > { %399 = vmatprep.subr.bf16.mxu0 %v193_v4  ;;  %215 = vperm.xlu1 %461, %v201_v8   ;;  %v463_v11 = vld [vmem:[%s779_s0 + $0x8] sm:$0xff]   ;;  %s494_s6 = scalar_lea.vmem %s730_s5, 512  ;;  %p790_p11 = scmp.ne.s32.totalorder %s786_s24, 0 }
  0x3d   : > { %400 = vmatpush3.bf16.msra.mxu0 %v193_v4  ;;  %205 = vperm.xlu0 %460, %v199_v9   ;;  %v200_v12 = vld [vmem:[%s780_s1 + $0x8] sm:$0xff]  ;;  %p495_p6 = scmp.ne.s32.totalorder %s730_s5, %s494_s6  ;;  %s567_s7 = smov [#allocation5]  }
  0x3e   : > { %401 = vmatprep.subr.bf16.mxu0 %v194_v6  ;;  %s498_s8 = sshll.u32 %s567_s7, 4  ;;  %s499_s8 = int_to_ptr.vmem [resolvable:$false] %s498_s8 }
  0x3f   : > { %p496_p12 = pnand %p495_p6, %p790_p11  ;;  %s500_s23 = scalar_lea.vmem %s499_s8, 1024 }
  0x40   : > { %220 = vperm.xlu1 %461, %v202_v10   ;;  %p501_p4 = scmp.lt.s32.totalorder %s730_s5, %s499_s8  ;;  %p502_p10 = scmp.lt.s32.totalorder %s500_s23, %s494_s6 }
  0x41   : > { %402 = vmatpush3.bf16.msra.mxu0 %v194_v6  ;;  %210 = vperm.xlu0 %460, %v200_v12   ;;  %p497_p13 = pneg %p496_p12 }
  0x42   : > { %p503_p1 = por %p502_p10, %p501_p4 }
  0x44   : > { %404 = vmatmul.mubr.msk.bf16.vlgmr.msra.gmra.mrb[0].mxu0 %vm233_vm0, %v463_v11  ;;  %p504_p3 = pnand %p503_p1, %p497_p13 }
  0xbb   : > { %v216_v13 = vpop.permute.xlu1 %215 }
  0xbc   : > { %v206_v14 = vpop.permute.xlu0 %205 }
  0xbf   : > { %v221_v18 = vpop.permute.xlu1 %220 }
  0xc0   : > { %v211_v21 = vpop.permute.xlu0 %210 }
 0x117   : > { %v405_v15 = vpop.f32.mrb[0].mxu0 }
 0x118   : > { %v283_v16 = vadd.f32 %v405_v15, %v216_v13  ;;  %v274_v17 = vpop.f32.mrb[1].mxu0 }
 0x119   : > { %v275_v19 = vadd.f32 %v274_v17, %v206_v14  ;;  %v406_v20 = vpop.f32.mrb[2].mxu0 }
 0x11a   : > { %291 = vst [vmem:[%s187_s30 + $0x10] sm:$0xff] %v283_v16  ;;  %v286_v22 = vadd.f32 %v406_v20, %v221_v18  ;;  %v277_v23 = vpop.f32.mrb[3].mxu0 }
 0x11b   : > { %289 = vst [vmem:[%s187_s30] sm:$0xff] %v275_v19  ;;  %v278_v24 = vadd.f32 %v277_v23, %v211_v21 }
 0x11c   : > { %292 = vst [vmem:[%s187_s30 + $0x18] sm:$0xff] %v286_v22 }
 0x11d   : > { %290 = vst [vmem:[%s187_s30 + $0x8] sm:$0xff] %v278_v24 }
 0x11e   : > { %507 = shalt.err (!%p504_p3)
}
 0x11f   : > { %s508_s19 = scalar_lea.hbm %s735_s16, 512  ;;  %s512_s26 = scalar_lea.hbm %s782_s3, 1024 }
 0x120   : > { %p509_p5 = scmp.ne.s32.totalorder %s735_s16, %s508_s19  ;;  %p513_p9 = scmp.lt.u32.totalorder %s735_s16, %s782_s3 }
 0x121   : > { %p514_p0 = scmp.lt.u32.totalorder %s512_s26, %s508_s19  ;;  %p516_p6 = scmp.lt.u32.totalorder %s508_s19, %s735_s16 }
 0x122   : > { %p510_p7 = pnand %p509_p5, %p790_p11 }
 0x123   : > { %p515_p2 = por %p514_p0, %p513_p9 }
 0x124   : > { %p511_p8 = pneg %p510_p7 }
 0x125   : > { %p517_p12 = por %p516_p6, %p515_p2 }
 0x127   : > { %p518_p13 = pnand %p517_p12, %p511_p8 }
 0x129   : > { %521 = shalt.err (!%p518_p13)
}
 0x12a   : > { %s568_s29 = smov 128   ;;  %s569_s30 = smov 256  }
 0x12b   : > { %s570_s11 = smov 8  }
 0x12c   : > { %409 = dma.vmem_to_hbm [thread:$0]  (%p790_p11), %s730_s5, 512, %s735_s16, %s294_s4, %s568_s29, %s569_s30, %s570_s11  }
 0x12d PF: > { %s321_s10 = sand.u32 1, %s548_s12   ;;  %p791_p4 = scmp.ne.s32.totalorder %s787_s25, 0 }
 0x12e   : > { %p792_p10 = scmp.ge.s32.totalorder %s560_s15, 2  ;;  %s322_s17 = scalar_lea.sflag [#allocation4], %s321_s10 }
 0x130   : > { %p416_p1 = pnand %p792_p10, %p791_p4 }
 0x132   : > { %543 = dma.done.wait (!%p416_p1), %s322_s17, 512  }
 0x133   : > { %545 = vsyncadd (!%p416_p1), %s322_s17, 4294966784  ;;  %p16_p3 = scmp.ge.s32.totalorder %s616_s18, 4   ;;  %s793_s12 = smov %s552_s13 }
 0x134   : > { %s794_s13 = smov %s556_s14  ;;  %s795_s14 = smov %s628_s21 }
 0x135   : > { %s796_s15 = smov %s616_s18  ;;  %18 = sbr.rel (!%p16_p3) target bundleno = 5 (0x5), region = 77 }
 0x13c   :  { %327 = vsyncpa [#allocation3], 1 }
 0x13d   :  { %329 = vsyncpa [#allocation3 + $0x1], 1 }
 0x13e   :  { %330 = vsyncpa [#allocation4], 1 }
 0x13f   :  { %332 = vsyncpa [#allocation4 + $0x1], 1 }

</bundles_post_ra>
